<compile_context>
chip_gen: v5e
topology: v5e:2x2
jax: 0.10.0
libtpu: 0.0.40
codegen_flags: <defaults>
</compile_context>

<pallas_src>
import jax
import jax.numpy as jnp
from jax.experimental import pallas as pl
from jax.experimental.pallas import tpu as pltpu

CONVS = ((8, 2), (8, 3))   # (num_filters f, kernel height n) per conv branch
LANES = 128                # lane group width for packed weights / features


def _elu(v):
    # F.elu with alpha=1:  x if x > 0 else exp(x) - 1
    return jnp.where(v > 0.0, v, jnp.exp(jnp.minimum(v, 0.0)) - 1.0)


def _make_kernel(convs, TB, S, Vpad, G, P):
    TBS = TB * S
    GP = G * P

    def kernel(tok_ref, wfold_ref, cbias_ref, hww_ref, hwb_ref,
               outw_ref, outb_ref, out_ref):
        # ---- fused embedding lookup + ALL conv taps in ONE MXU matmul --------
        tok = tok_ref[...]                                           # (TBS, 1) int32
        pos = jax.lax.broadcasted_iota(jnp.int32, (TBS, Vpad), 1)
        onehot = jnp.where(pos == tok, 1.0, 0.0).astype(jnp.bfloat16)
        cv = jnp.dot(onehot, wfold_ref[...],
                     preferred_element_type=jnp.float32)             # (TBS, G*P)
        cv = cv.reshape(TB, S, GP)

        # ---- tap shift-add: every lane slice is a full 128-aligned group -----
        # Each branch already sits at its final feature lane offset inside its
        # groups, so pooled branches combine with a plain add (no concatenate).
        cb_all = cbias_ref[...]                                      # (n_branches, P)
        pooled = None
        g = 0
        for b, (f, n) in enumerate(convs):
            L = S - n + 1
            acc = cv[:, 0:L, g * P:(g + 1) * P]
            for k in range(1, n):
                acc = acc + cv[:, k:k + L, (g + k) * P:(g + k + 1) * P]
            acc = acc + cb_all[b].reshape(1, 1, P)
            # F.elu(conv(x)) then F.max_pool1d over the whole valid length.
            feat = jnp.max(_elu(acc), axis=1)                        # (TB, P)
            pooled = feat if pooled is None else pooled + feat
            g += n
        x = pooled                                                   # (TB, P), lanes >= Fsum are 0

        # ---- highway: h = Linear(x); t = sigmoid(h); x = t*elu(h) + (1-t)*x ---
        h = jnp.dot(x.astype(jnp.bfloat16), hww_ref[...],
                    preferred_element_type=jnp.float32) + hwb_ref[...]
        t = pl.reciprocal(1.0 + jnp.exp(-h), approx=True)            # sigmoid via EUP recip
        xh = t * _elu(h) + (1.0 - t) * x
        # nn.Dropout(p=0) is identity.
        # TODO(synk): stochastic dropout (p>0, training mode) not implemented.

        # ---- final 1-wide projection: VPU multiply + lane reduce (f32) --------
        res = jnp.sum(xh * outw_ref[...], axis=-1, keepdims=True) + outb_ref[...]
        out_ref[...] = res                                           # (TB, 1): 4 B/seq writeback

    return kernel


def prepare_params(params, convs=CONVS, lanes=LANES):
    """Pack / pad / fold all weights ONCE (not per forward call)."""
    emb_table = params["emb_table"]
    vocab, D = emb_table.shape
    Fsum = sum(f for f, _ in convs)
    G = sum(n for _, n in convs)          # one 128-lane group per (branch, tap)
    assert Fsum <= lanes

    Vpad = -(-vocab // 16) * 16           # bf16 packs 16 rows / vreg
    embt = jnp.zeros((Vpad, D), jnp.float32).at[:vocab].set(emb_table)

    # Wide conv weight (D, G*lanes): group g = (branch b, tap k); inside group g
    # the branch's filters occupy lanes [foff_b, foff_b + f) — their FINAL
    # feature offsets — so pooled features land in place with no concatenate.
    wcat = jnp.zeros((D, G * lanes), jnp.float32)
    g, foff = 0, 0
    for (f, n), (w, _) in zip(convs, params["convs"]):           # w: (f, n, D)
        for k in range(n):
            col = g * lanes + foff
            wcat = wcat.at[:, col:col + f].set(jnp.transpose(w[:, k, :]))
            g += 1
        foff += f

    # Fold embedding @ conv weights in f32, single bf16 rounding at the end.
    wfold = (embt @ wcat).astype(jnp.bfloat16)                   # (Vpad, G*lanes)

    # Per-branch bias rows, already at final feature lane offsets (zeros elsewhere
    # keep the padded lanes exactly 0 through elu/max/highway).
    cbias = jnp.zeros((len(convs), lanes), jnp.float32)
    foff = 0
    for b, ((f, _), (_, bias)) in enumerate(zip(convs, params["convs"])):
        cbias = cbias.at[b, foff:foff + f].set(bias)
        foff += f

    hww = jnp.zeros((lanes, lanes), jnp.float32)
    hww = hww.at[:Fsum, :Fsum].set(params["hw_w"].T).astype(jnp.bfloat16)
    hwb = jnp.pad(params["hw_b"], (0, lanes - Fsum)).reshape(1, lanes).astype(jnp.float32)
    outw = jnp.pad(params["out_w"].reshape(-1), (0, lanes - Fsum))
    outw = outw.reshape(1, lanes).astype(jnp.float32)
    outb = params["out_b"].reshape(1, 1).astype(jnp.float32)

    return {"wfold": wfold, "cbias": cbias, "hww": hww, "hwb": hwb,
            "outw": outw, "outb": outb}


def _default_batch_tile(B, S):
    """Pick a batch tile that gives >=2 'parallel' grid steps when possible
    (v7x has 2 TensorCores) while keeping TB*S around ~2K rows so per-step
    overhead (~0.35 us) stays amortized and the cv intermediate stays small."""
    if B < 16:
        return B
    target_rows = 2048
    best = B
    for tb in range(8, B, 8):
        if B % tb == 0 and tb * S <= target_rows:
            best = tb                     # keep the largest valid divisor
    return best


def discriminator_forward(tokens, packed, convs=CONVS, batch_tile=None, lanes=LANES):
    B, S = tokens.shape
    Vpad, GP = packed["wfold"].shape
    G = GP // lanes
    NB = len(convs)

    tb = batch_tile if batch_tile is not None else _default_batch_tile(B, S)
    assert B % tb == 0 and (tb == B or tb % 8 == 0)

    tok2 = tokens.reshape(B * S, 1).astype(jnp.int32)
    kernel = _make_kernel(convs, tb, S, Vpad, G, lanes)

    # NOTE: for production vocab sizes, the grid-invariant weight specs below can
    # be single-buffered with pipeline_mode=pl.Buffered(1) to halve their
    # resident VMEM (matters most on v7x / v5e scoped-VMEM defaults).
    out = pl.pallas_call(
        kernel,
        out_shape=jax.ShapeDtypeStruct((B, 1), jnp.float32),
        grid=(B // tb,),
        in_specs=[
            pl.BlockSpec((tb * S, 1), lambda i: (i, 0)),      # tokens
            pl.BlockSpec((Vpad, GP), lambda i: (0, 0)),       # folded emb+conv table (bf16)
            pl.BlockSpec((NB, lanes), lambda i: (0, 0)),      # per-branch conv biases
            pl.BlockSpec((lanes, lanes), lambda i: (0, 0)),   # highway W (padded, bf16)
            pl.BlockSpec((1, lanes), lambda i: (0, 0)),       # highway b (padded)
            pl.BlockSpec((1, lanes), lambda i: (0, 0)),       # output W row (padded)
            pl.BlockSpec((1, 1), lambda i: (0, 0)),           # output b
        ],
        out_specs=pl.BlockSpec((tb, 1), lambda i: (i, 0)),
        compiler_params=pltpu.CompilerParams(
            dimension_semantics=("parallel",),
            vmem_limit_bytes=32 * 1024 * 1024),
    )(tok2, packed["wfold"], packed["cbias"], packed["hww"],
      packed["hwb"], packed["outw"], packed["outb"])

    return out


def reference_forward(tokens, params, convs=CONVS):
    """Pure-JAX f32 reference mirroring the PyTorch forward exactly."""
    emb = jnp.take(params["emb_table"], tokens, axis=0)           # (B, S, D)
    B, S, D = emb.shape
    feats = []
    for (f, n), (w, b) in zip(convs, params["convs"]):            # w: (f, n, D)
        L = S - n + 1
        win = jnp.stack([emb[:, t:t + n, :].reshape(B, n * D) for t in range(L)],
                        axis=1)                                   # (B, L, n*D)
        s = jnp.einsum("blk,fk->blf", win, w.reshape(f, n * D)) + b
        feats.append(jnp.max(jax.nn.elu(s), axis=1))
    x = jnp.concatenate(feats, axis=1)
    h = x @ params["hw_w"].T + params["hw_b"]
    t = jax.nn.sigmoid(h)
    x2 = t * jax.nn.elu(h) + (1.0 - t) * x
    return x2 @ params["out_w"].T + params["out_b"]


def _init_params(key, vocab, D, convs):
    Fsum = sum(f for f, _ in convs)
    keys = iter(jax.random.split(key, 1 + 2 * len(convs) + 4))
    params = {"emb_table": 0.1 * jax.random.normal(next(keys), (vocab, D), jnp.float32)}
    conv_params = []
    for f, n in convs:
        # PyTorch Conv2d(1, f, (n, D)) weight is (f, 1, n, D); store it squeezed.
        w = 0.1 * jax.random.normal(next(keys), (f, n, D), jnp.float32)
        b = 0.1 * jax.random.normal(next(keys), (f,), jnp.float32)
        conv_params.append((w, b))
    params["convs"] = conv_params
    params["hw_w"] = 0.1 * jax.random.normal(next(keys), (Fsum, Fsum), jnp.float32)
    params["hw_b"] = 0.1 * jax.random.normal(next(keys), (Fsum,), jnp.float32)
    params["out_w"] = 0.1 * jax.random.normal(next(keys), (1, Fsum), jnp.float32)
    params["out_b"] = 0.1 * jax.random.normal(next(keys), (1,), jnp.float32)
    return params


if __name__ == "__main__":
    key = jax.random.PRNGKey(0)
    k_tok, k_par = jax.random.split(key)

    B, S, vocab, D = 2, 8, 20, 32
    params = _init_params(k_par, vocab, D, CONVS)
    packed = prepare_params(params, CONVS)
    tokens = jax.random.randint(k_tok, (B, S), 0, vocab, dtype=jnp.int32)

    out = discriminator_forward(tokens, packed)
    out = jax.block_until_ready(out)

    ref = reference_forward(tokens, params)
    assert out.shape == (B, 1), out.shape
    # bf16 MXU inputs (f32 accumulation) vs an all-f32 reference -> relaxed tol.
    assert jnp.allclose(out, ref, atol=1e-2, rtol=1e-2), (out, ref)

    print("KERNEL_OK")
</pallas_src>

<mosaic_0001>
module attributes {stable_mosaic.version = 11 : i64} {
  func.func @kernel(%arg0: i32, %arg1: memref<16x1xi32, #tpu.memory_space<vmem>>, %arg2: memref<32x640xbf16, #tpu.memory_space<vmem>>, %arg3: memref<2x128xf32, #tpu.memory_space<vmem>>, %arg4: memref<128x128xbf16, #tpu.memory_space<vmem>>, %arg5: memref<1x128xf32, #tpu.memory_space<vmem>>, %arg6: memref<1x128xf32, #tpu.memory_space<vmem>>, %arg7: memref<1x1xf32, #tpu.memory_space<vmem>>, %arg8: memref<2x1xf32, #tpu.memory_space<vmem>>) attributes {dimension_semantics = [#tpu.dimension_semantics<parallel>], iteration_bounds = array<i64: 1>, scalar_prefetch = 0 : i64, scratch_operands = 0 : i64, tpu.core_type = #tpu.core_type<tc>, window_params = [{transform_indices = @transform_0, window_bounds = array<i64: 16, 1>}, {pipeline_mode = #tpu.pipeline_mode<synchronous>, transform_indices = @transform_1, window_bounds = array<i64: 32, 640>}, {pipeline_mode = #tpu.pipeline_mode<synchronous>, transform_indices = @transform_2, window_bounds = array<i64: 2, 128>}, {pipeline_mode = #tpu.pipeline_mode<synchronous>, transform_indices = @transform_3, window_bounds = array<i64: 128, 128>}, {pipeline_mode = #tpu.pipeline_mode<synchronous>, transform_indices = @transform_4, window_bounds = array<i64: 1, 128>}, {pipeline_mode = #tpu.pipeline_mode<synchronous>, transform_indices = @transform_5, window_bounds = array<i64: 1, 128>}, {pipeline_mode = #tpu.pipeline_mode<synchronous>, transform_indices = @transform_6, window_bounds = array<i64: 1, 1>}, {transform_indices = @transform_7, window_bounds = array<i64: 2, 1>}]} {
    %c0 = arith.constant 0 : index
    %c0_0 = arith.constant 0 : index
    %0 = vector.load %arg1[%c0, %c0_0] : memref<16x1xi32, #tpu.memory_space<vmem>>, vector<16x1xi32>
    %1 = tpu.iota {dimensions = array<i32: 1>} : vector<16x32xi32>
    %2 = vector.broadcast %0 : vector<16x1xi32> to vector<16x32xi32>
    %3 = arith.cmpi eq, %1, %2 : vector<16x32xi32>
    %cst = arith.constant 1.000000e+00 : f32
    %cst_1 = arith.constant 0.000000e+00 : f32
    %4 = vector.broadcast %cst : f32 to vector<16x32xf32>
    %5 = vector.broadcast %cst_1 : f32 to vector<16x32xf32>
    %6 = arith.select %3, %4, %5 : vector<16x32xi1>, vector<16x32xf32>
    %7 = arith.truncf %6 : vector<16x32xf32> to vector<16x32xbf16>
    %c0_2 = arith.constant 0 : index
    %c0_3 = arith.constant 0 : index
    %8 = vector.load %arg2[%c0_2, %c0_3] : memref<32x640xbf16, #tpu.memory_space<vmem>>, vector<32x640xbf16>
    %cst_4 = arith.constant dense<0.000000e+00> : vector<16x640xf32>
    %9 = tpu.matmul %7, %8, %cst_4 {dimension_numbers = #tpu.dot_dimension_numbers<[1], [0], [0], [1], [0, 0, 1, 1], [], []>} : vector<16x32xbf16>, vector<32x640xbf16>, vector<16x640xf32> -> vector<16x640xf32>
    %10 = vector.shape_cast %9 : vector<16x640xf32> to vector<2x8x640xf32>
    %c0_5 = arith.constant 0 : index
    %c0_6 = arith.constant 0 : index
    %11 = vector.load %arg3[%c0_5, %c0_6] : memref<2x128xf32, #tpu.memory_space<vmem>>, vector<2x128xf32>
    %12 = vector.extract_strided_slice %10 {offsets = [0, 0, 0], sizes = [2, 7, 128], strides = [1, 1, 1]} : vector<2x8x640xf32> to vector<2x7x128xf32>
    %13 = vector.extract_strided_slice %10 {offsets = [0, 1, 128], sizes = [2, 7, 128], strides = [1, 1, 1]} : vector<2x8x640xf32> to vector<2x7x128xf32>
    %14 = arith.addf %12, %13 : vector<2x7x128xf32>
    %15 = vector.extract_strided_slice %11 {offsets = [0, 0], sizes = [1, 128], strides = [1, 1]} : vector<2x128xf32> to vector<1x128xf32>
    %16 = vector.shape_cast %15 : vector<1x128xf32> to vector<128xf32>
    %17 = vector.shape_cast %16 : vector<128xf32> to vector<1x1x128xf32>
    %18 = vector.broadcast %17 : vector<1x1x128xf32> to vector<2x7x128xf32>
    %19 = arith.addf %14, %18 : vector<2x7x128xf32>
    %cst_7 = arith.constant 0.000000e+00 : f32
    %20 = vector.broadcast %cst_7 : f32 to vector<2x7x128xf32>
    %21 = arith.cmpf ogt, %19, %20 : vector<2x7x128xf32>
    %cst_8 = arith.constant 0.000000e+00 : f32
    %22 = vector.broadcast %cst_8 : f32 to vector<2x7x128xf32>
    %23 = arith.minimumf %19, %22 : vector<2x7x128xf32>
    %24 = math.exp %23 : vector<2x7x128xf32>
    %cst_9 = arith.constant 1.000000e+00 : f32
    %25 = vector.broadcast %cst_9 : f32 to vector<2x7x128xf32>
    %26 = arith.subf %24, %25 : vector<2x7x128xf32>
    %27 = arith.select %21, %19, %26 : vector<2x7x128xi1>, vector<2x7x128xf32>
    %cst_10 = arith.constant dense<0xFF800000> : vector<2x128xf32>
    %28 = vector.multi_reduction <maximumf>, %27, %cst_10 [1] : vector<2x7x128xf32> to vector<2x128xf32>
    %29 = vector.extract_strided_slice %10 {offsets = [0, 0, 256], sizes = [2, 6, 128], strides = [1, 1, 1]} : vector<2x8x640xf32> to vector<2x6x128xf32>
    %30 = vector.extract_strided_slice %10 {offsets = [0, 1, 384], sizes = [2, 6, 128], strides = [1, 1, 1]} : vector<2x8x640xf32> to vector<2x6x128xf32>
    %31 = arith.addf %29, %30 : vector<2x6x128xf32>
    %32 = vector.extract_strided_slice %10 {offsets = [0, 2, 512], sizes = [2, 6, 128], strides = [1, 1, 1]} : vector<2x8x640xf32> to vector<2x6x128xf32>
    %33 = arith.addf %31, %32 : vector<2x6x128xf32>
    %34 = vector.extract_strided_slice %11 {offsets = [1, 0], sizes = [1, 128], strides = [1, 1]} : vector<2x128xf32> to vector<1x128xf32>
    %35 = vector.shape_cast %34 : vector<1x128xf32> to vector<128xf32>
    %36 = vector.shape_cast %35 : vector<128xf32> to vector<1x1x128xf32>
    %37 = vector.broadcast %36 : vector<1x1x128xf32> to vector<2x6x128xf32>
    %38 = arith.addf %33, %37 : vector<2x6x128xf32>
    %cst_11 = arith.constant 0.000000e+00 : f32
    %39 = vector.broadcast %cst_11 : f32 to vector<2x6x128xf32>
    %40 = arith.cmpf ogt, %38, %39 : vector<2x6x128xf32>
    %cst_12 = arith.constant 0.000000e+00 : f32
    %41 = vector.broadcast %cst_12 : f32 to vector<2x6x128xf32>
    %42 = arith.minimumf %38, %41 : vector<2x6x128xf32>
    %43 = math.exp %42 : vector<2x6x128xf32>
    %cst_13 = arith.constant 1.000000e+00 : f32
    %44 = vector.broadcast %cst_13 : f32 to vector<2x6x128xf32>
    %45 = arith.subf %43, %44 : vector<2x6x128xf32>
    %46 = arith.select %40, %38, %45 : vector<2x6x128xi1>, vector<2x6x128xf32>
    %cst_14 = arith.constant dense<0xFF800000> : vector<2x128xf32>
    %47 = vector.multi_reduction <maximumf>, %46, %cst_14 [1] : vector<2x6x128xf32> to vector<2x128xf32>
    %48 = arith.addf %28, %47 : vector<2x128xf32>
    %49 = arith.truncf %48 : vector<2x128xf32> to vector<2x128xbf16>
    %c0_15 = arith.constant 0 : index
    %c0_16 = arith.constant 0 : index
    %50 = vector.load %arg4[%c0_15, %c0_16] : memref<128x128xbf16, #tpu.memory_space<vmem>>, vector<128x128xbf16>
    %cst_17 = arith.constant dense<0.000000e+00> : vector<2x128xf32>
    %51 = tpu.matmul %49, %50, %cst_17 {dimension_numbers = #tpu.dot_dimension_numbers<[1], [0], [0], [1], [0, 0, 1, 1], [], []>} : vector<2x128xbf16>, vector<128x128xbf16>, vector<2x128xf32> -> vector<2x128xf32>
    %c0_18 = arith.constant 0 : index
    %c0_19 = arith.constant 0 : index
    %52 = vector.load %arg5[%c0_18, %c0_19] : memref<1x128xf32, #tpu.memory_space<vmem>>, vector<1x128xf32>
    %53 = vector.broadcast %52 : vector<1x128xf32> to vector<2x128xf32>
    %54 = arith.addf %51, %53 : vector<2x128xf32>
    %cst_20 = arith.constant 0.000000e+00 : f32
    %55 = vector.broadcast %cst_20 : f32 to vector<2x128xf32>
    %56 = arith.subf %55, %54 : vector<2x128xf32>
    %57 = math.exp %56 : vector<2x128xf32>
    %cst_21 = arith.constant 1.000000e+00 : f32
    %58 = vector.broadcast %cst_21 : f32 to vector<2x128xf32>
    %59 = arith.addf %58, %57 : vector<2x128xf32>
    %60 = tpu.reciprocal %59 {approx = true} : vector<2x128xf32> -> vector<2x128xf32>
    %cst_22 = arith.constant 0.000000e+00 : f32
    %61 = vector.broadcast %cst_22 : f32 to vector<2x128xf32>
    %62 = arith.cmpf ogt, %54, %61 : vector<2x128xf32>
    %cst_23 = arith.constant 0.000000e+00 : f32
    %63 = vector.broadcast %cst_23 : f32 to vector<2x128xf32>
    %64 = arith.minimumf %54, %63 : vector<2x128xf32>
    %65 = math.exp %64 : vector<2x128xf32>
    %cst_24 = arith.constant 1.000000e+00 : f32
    %66 = vector.broadcast %cst_24 : f32 to vector<2x128xf32>
    %67 = arith.subf %65, %66 : vector<2x128xf32>
    %68 = arith.select %62, %54, %67 : vector<2x128xi1>, vector<2x128xf32>
    %69 = arith.mulf %60, %68 : vector<2x128xf32>
    %cst_25 = arith.constant 1.000000e+00 : f32
    %70 = vector.broadcast %cst_25 : f32 to vector<2x128xf32>
    %71 = arith.subf %70, %60 : vector<2x128xf32>
    %72 = arith.mulf %71, %48 : vector<2x128xf32>
    %73 = arith.addf %69, %72 : vector<2x128xf32>
    %c0_26 = arith.constant 0 : index
    %c0_27 = arith.constant 0 : index
    %74 = vector.load %arg6[%c0_26, %c0_27] : memref<1x128xf32, #tpu.memory_space<vmem>>, vector<1x128xf32>
    %75 = vector.broadcast %74 : vector<1x128xf32> to vector<2x128xf32>
    %76 = arith.mulf %73, %75 : vector<2x128xf32>
    %cst_28 = arith.constant dense<0.000000e+00> : vector<2xf32>
    %77 = vector.multi_reduction <add>, %76, %cst_28 [1] : vector<2x128xf32> to vector<2xf32>
    %78 = vector.shape_cast %77 : vector<2xf32> to vector<2x1xf32>
    %c0_29 = arith.constant 0 : index
    %c0_30 = arith.constant 0 : index
    %79 = vector.load %arg7[%c0_29, %c0_30] : memref<1x1xf32, #tpu.memory_space<vmem>>, vector<1x1xf32>
    %80 = vector.broadcast %79 : vector<1x1xf32> to vector<2x1xf32>
    %81 = arith.addf %78, %80 : vector<2x1xf32>
    %c0_31 = arith.constant 0 : index
    %c0_32 = arith.constant 0 : index
    %82 = vector.load %arg8[%c0_31, %c0_32] : memref<2x1xf32, #tpu.memory_space<vmem>>, vector<2x1xf32>
    tpu.vector_store %arg8[%c0_31, %c0_32], %81 {strides = array<i32>} : memref<2x1xf32, #tpu.memory_space<vmem>>, vector<2x1xf32>,
    return
  }
  func.func @transform_0(%arg0: i32) -> (i32, i32) {
    %c0_i32 = arith.constant 0 : i32
    %c0_i32_0 = arith.constant 0 : i32
    return %arg0, %c0_i32 : i32, i32
  }
  func.func @transform_1(%arg0: i32) -> (i32, i32) {
    %c0_i32 = arith.constant 0 : i32
    %c0_i32_0 = arith.constant 0 : i32
    %c0_i32_1 = arith.constant 0 : i32
    return %c0_i32, %c0_i32_0 : i32, i32
  }
  func.func @transform_2(%arg0: i32) -> (i32, i32) {
    %c0_i32 = arith.constant 0 : i32
    %c0_i32_0 = arith.constant 0 : i32
    %c0_i32_1 = arith.constant 0 : i32
    return %c0_i32, %c0_i32_0 : i32, i32
  }
  func.func @transform_3(%arg0: i32) -> (i32, i32) {
    %c0_i32 = arith.constant 0 : i32
    %c0_i32_0 = arith.constant 0 : i32
    %c0_i32_1 = arith.constant 0 : i32
    return %c0_i32, %c0_i32_0 : i32, i32
  }
  func.func @transform_4(%arg0: i32) -> (i32, i32) {
    %c0_i32 = arith.constant 0 : i32
    %c0_i32_0 = arith.constant 0 : i32
    %c0_i32_1 = arith.constant 0 : i32
    return %c0_i32, %c0_i32_0 : i32, i32
  }
  func.func @transform_5(%arg0: i32) -> (i32, i32) {
    %c0_i32 = arith.constant 0 : i32
    %c0_i32_0 = arith.constant 0 : i32
    %c0_i32_1 = arith.constant 0 : i32
    return %c0_i32, %c0_i32_0 : i32, i32
  }
  func.func @transform_6(%arg0: i32) -> (i32, i32) {
    %c0_i32 = arith.constant 0 : i32
    %c0_i32_0 = arith.constant 0 : i32
    %c0_i32_1 = arith.constant 0 : i32
    return %c0_i32, %c0_i32_0 : i32, i32
  }
  func.func @transform_7(%arg0: i32) -> (i32, i32) {
    %c0_i32 = arith.constant 0 : i32
    %c0_i32_0 = arith.constant 0 : i32
    return %arg0, %c0_i32 : i32, i32
  }
}

</mosaic_0001>

<bundles_post_ra>
// kernel: tpu_custom_call.1
= control target key start
LH: loop header
LB: loop body
LE: loop exit
PB: predicated region body
PF: predicated region fallthrough
CT: control target
= control target key end

     0   :  { %s688_s0 = inlined_call_operand.vmem [shape: s32[16,1], index: 0, kind: input, shape index: {}]   ;;  %s689_s1 = inlined_call_operand.hbm [shape: bf16[32,640], index: 1, kind: input, shape index: {}]   ;;  %s690_s2 = inlined_call_operand.vmem [shape: f32[2,128], index: 2, kind: input, shape index: {}]   ;;  %s691_s3 = inlined_call_operand.hbm [shape: bf16[128,128], index: 3, kind: input, shape index: {}]   ;;  %s692_s4 = inlined_call_operand.vmem [shape: f32[1,128], index: 4, kind: input, shape index: {}]   ;;  %s693_s5 = inlined_call_operand.vmem [shape: f32[1,128], index: 5, kind: input, shape index: {}]   ;;  %s694_s6 = inlined_call_operand.<no memory space> [shape: f32[1,1], index: 6, kind: input, shape index: {}]   ;;  %s695_s7 = inlined_call_operand.vmem [shape: f32[2,1], index: 7, kind: output, shape index: {}]  }
   0x1   :  { %v12_v0 = vstv %s694_s6 }
   0x2   :  { %13 = vst [vmem:[#allocation2] sm:$0x1] %v12_v0 }
   0x3   :  { %14 = vsyncpa [#allocation4], 0  ;;  %s22_s28 = sshll.u32 %s689_s1, 4  ;;  %s23_s28 = int_to_ptr.hbm [resolvable:$true] %s22_s28 }
   0x4   :  { %15 = vsyncpa [#allocation6], 0  ;;  %s611_s29 = smov [#allocation3]   ;;  %s37_s10 = sshll.u32 %s691_s3, 4  ;;  %s38_s10 = int_to_ptr.hbm [resolvable:$true] %s37_s10 }
   0x5   :  { %s24_s30 = sshll.u32 %s611_s29, 4  ;;  %s612_s11 = smov 320   ;;  %s25_s30 = int_to_ptr.vmem [resolvable:$true] %s24_s30 }
   0x6   :  { %s613_s12 = smov 20   ;;  %s614_s6 = smov [#allocation5]  }
   0x7   :  { %30 = dma.hbm_to_vmem [thread:$0]  %s23_s28, 1280, %s25_s30, [#allocation4], %s612_s11, %s612_s11, %s613_s12  }
   0x8   :  { %s39_s13 = sshll.u32 %s614_s6, 4  ;;  %s615_s14 = smov 64   ;;  %s40_s13 = int_to_ptr.vmem [resolvable:$true] %s39_s13 }
   0x9   :  { %s616_s15 = smov 4  }
   0xa   :  { %45 = dma.hbm_to_vmem [thread:$0]  %s38_s10, 1024, %s40_s13, [#allocation6], %s615_s14, %s615_s14, %s616_s15  }
   0xb   :  { %607 = dma.done.wait [#allocation4], 1280  }
   0xc   :  { %608 = vsyncadd [#allocation4], 4294966016 }
   0xd   :  { %609 = dma.done.wait [#allocation6], 1024  }
   0xe   :  { %610 = vsyncadd [#allocation6], 4294966272  ;;  %v617_v1 = vmov 0   ;;  %v61_v2 = vld [vmem:[%s688_s0] sm:$0xff]  ;;  %v62_v3 = vld [vmem:[%s688_s0 + $0x8] sm:$0xff]  ;;  %v63_v34 = vlaneseq  ;;  %v618_v38 = vmov 0.0  }
   0xf   :  { %541 = vset.pattern.permute.xlu0 %v617_v1  ;;  %v455_v4 = vld [vmem:[#allocation3 + $0x28] sm:$0xf]  ;;  %v522_v5 = vld [vmem:[#allocation3 + $0x38] sm:$0xf0]  ;;  %v520_v6 = vld [vmem:[#allocation3 + $0x2c] sm:$0xf] }
  0x10   :  { %66 = vperm.xlu0 %541, %v61_v2   ;;  %v456_v7 = vor.u32 %v522_v5, %v455_v4  ;;  %v457_v8 = vld [vmem:[#allocation3 + $0x3c] sm:$0xf0]  ;;  %v521_v9 = vld [vmem:[#allocation3 + $0x34] sm:$0xf]  ;;  %v465_v10 = vld [vmem:[#allocation3 + $0x44] sm:$0xf0] }
  0x11   :  { %v460_v11 = vor.u32 %v520_v6, %v457_v8  ;;  %v468_v12 = vor.u32 %v521_v9, %v465_v10  ;;  %v435_v13 = vld [vmem:[#allocation3] sm:$0xf]  ;;  %v517_v14 = vld [vmem:[#allocation3 + $0x10] sm:$0xf0]  ;;  %v515_v15 = vld [vmem:[#allocation3 + $0x4] sm:$0xf] }
  0x12   :  { %150 = vmatpush.bf16.msra.mxu0 %v456_v7  ;;  %v436_v16 = vor.u32 %v517_v14, %v435_v13  ;;  %v437_v17 = vld [vmem:[#allocation3 + $0x14] sm:$0xf0]  ;;  %v516_v18 = vld [vmem:[#allocation3 + $0xc] sm:$0xf]  ;;  %v445_v19 = vld [vmem:[#allocation3 + $0x1c] sm:$0xf0] }
  0x13   :  { %164 = vmatpush.bf16.msra.mxu2 %v460_v11  ;;  %192 = vmatpush.bf16.msra.mxu3 %v468_v12  ;;  %v440_v20 = vor.u32 %v515_v15, %v437_v17  ;;  %v448_v21 = vor.u32 %v516_v18, %v445_v19  ;;  %v463_v22 = vld [vmem:[#allocation3 + $0x30] sm:$0xf]  ;;  %v523_v23 = vld [vmem:[#allocation3 + $0x40] sm:$0xf0]  ;;  %v471_v25 = vld [vmem:[#allocation3 + $0x38] sm:$0xf] }
  0x14   :  { %v464_v24 = vor.u32 %v523_v23, %v463_v22  ;;  %v524_v26 = vld [vmem:[#allocation3 + $0x48] sm:$0xf0]  ;;  %v443_v27 = vld [vmem:[#allocation3 + $0x8] sm:$0xf]  ;;  %v518_v29 = vld [vmem:[#allocation3 + $0x18] sm:$0xf0] }
  0x15   :  { %v472_v28 = vor.u32 %v524_v26, %v471_v25  ;;  %v451_v30 = vld [vmem:[#allocation3 + $0x10] sm:$0xf]  ;;  %v519_v31 = vld [vmem:[#allocation3 + $0x20] sm:$0xf0]  ;;  %v444_v32 = vor.u32 %v518_v29, %v443_v27  ;;  %v64_v36 = vand.u32 127, %v63_v34  ;;  %vm140_vm2 = vcmask 261120  }
  0x16   :  { %151 = vmatpush.bf16.msra.mxu0 %v436_v16  ;;  %v452_v33 = vor.u32 %v519_v31, %v451_v30  ;;  %v214_v43 = vld [vmem:[%s690_s2] sm:$0x3]  ;;  %v532_v49 = vld [vmem:[#allocation5 + $0x38] sm:$0xff]  ;;  %v529_v63 = vld [vmem:[#allocation5 + $0x20] sm:$0xff]  ;;  %vm238_vm4 = vcmask 1046528   ;;  %vm284_vm6 = vcmask 1045504  }
  0x17   :  { %165 = vmatpush.bf16.msra.mxu2 %v440_v20  ;;  %193 = vmatpush.bf16.msra.mxu3 %v448_v21  ;;  %v223_v46 = vperm.slane %v214_v43, 0  ;;  %v531_v52 = vld [vmem:[#allocation5 + $0x30] sm:$0xff]  ;;  %v530_v58 = vld [vmem:[#allocation5 + $0x28] sm:$0xff]  ;;  %v269_v4 = vperm.slane %v214_v43, 1  ;;  %v528_v5 = vld [vmem:[#allocation5 + $0x18] sm:$0xff]  ;;  %vm327_vm9 = vcmask 1041409  }
  0x18   :  { %69 = vperm.xlu0 %541, %v62_v3   ;;  %379 = vmatpush.bf16.msra.mxu1 %v532_v49  ;;  %v527_v10 = vld [vmem:[#allocation5 + $0x10] sm:$0xff]  ;;  %v526_v20 = vld [vmem:[#allocation5 + $0x8] sm:$0xff]  ;;  %v525_v26 = vld [vmem:[#allocation5] sm:$0xff]  ;;  %vm416_vm11 = vcmask 1041408   ;;  %vm425_vm12 = vcmask 1024  }
  0x1a   :  { %206 = vmatpush.bf16.msrb.mxu0 %v472_v28 }
  0x1b   :  { %178 = vmatpush.bf16.msrb.mxu2 %v464_v24 }
  0x1c   :  { %380 = vmatpush.bf16.msra.mxu1 %v531_v52 }
  0x1e   :  { %207 = vmatpush.bf16.msrb.mxu0 %v452_v33 }
  0x1f   :  { %179 = vmatpush.bf16.msrb.mxu2 %v444_v32 }
  0x20   :  { %381 = vmatpush.bf16.msra.mxu1 %v530_v58 }
  0x24   :  { %382 = vmatpush.bf16.msra.mxu1 %v529_v63 }
  0x28   :  { %383 = vmatpush.bf16.msra.mxu1 %v528_v5 }
  0x2c   :  { %384 = vmatpush.bf16.msra.mxu1 %v527_v10 }
  0x30   :  { %385 = vmatpush.bf16.msra.mxu1 %v526_v20 }
  0x34   :  { %386 = vmatpush.bf16.msra.mxu1 %v525_v26 }
  0x82   :  { %v67_v35 = vpop.permute.xlu0 %66 }
  0x83   :  { %vm71_vm0 = vcmp.eq.s32.totalorder %v64_v36, %v67_v35 }
  0x84   :  { %v73_v39 = vsel %vm71_vm0, 1.0, %v618_v38 }
  0x8a   :  { %v70_v37 = vpop.permute.xlu0 %69 }
  0x8b   :  { %vm72_vm1 = vcmp.eq.s32.totalorder %v64_v36, %v70_v37 }
  0x8c   :  { %v74_v40 = vsel %vm72_vm1, 1.0, %v618_v38 }
  0x8d   :  { %v75_v41 = vpack.c.bf16 %v74_v40, %v73_v39 }
  0x8f   :  { %473 = vmatmul.msk.bf16.vlgmr.msra.gmra.mxu0 %vm140_vm2, %v75_v41  ;;  %474 = vmatmul.msk.bf16.vlgmr.msra.gmra.mxu2 %vm140_vm2, %v75_v41 }
  0x90   :  { %476 = vmatmul.msk.bf16.vlgmr.msra.gmra.mxu3 %vm140_vm2, %v75_v41 }
  0x9f   :  { %475 = vmatmul.msk.bf16.vlgmr.msrb.gmra.mxu2 %vm140_vm2, %v75_v41  ;;  %477 = vmatmul.msk.bf16.vlgmr.msrb.gmra.mxu0 %vm140_vm2, %v75_v41 }
 0x10c   :  { %v153_v42 = vpop.f32.mrf.mxu0 }
 0x112   :  { %v167_v44 = vpop.f32.mrf.mxu2 }
 0x113   :  { %v217_v45 = vrot.slane %v167_v44, 1  ;;  %v195_v56 = vpop.f32.mrf.mxu3 }
 0x114   :  { %v155_v47 = vpop.f32.mrf.mxu0  ;;  %v255_v61 = vrot.slane %v195_v56, 1 }
 0x115   :  { %v221_v48 = vadd.f32 %v217_v45, %v153_v42 }
 0x117   :  { %v224_v50 = vadd.f32 %v223_v46, %v221_v48 }
 0x119   :  { %v228_v51 = vmin.f32 %v224_v50, 0.0  ;;  %vm226_vm3 = vcmp.gt.f32.partialorder %v224_v50, 0.0 }
 0x11a   :  { %v169_v53 = vpop.f32.mrf.mxu2 }
 0x11b   :  { %v230_v54 = vmul.f32 1.442695, %v228_v51  ;;  %v218_v55 = vrot.slane %v169_v53, 1  ;;  %v197_v8 = vpop.f32.mrf.mxu3 }
 0x11c   :  { %v209_v59 = vpop.f32.mrf.mxu0  ;;  %v256_v13 = vrot.slane %v197_v8, 1  ;;  %v542_v8 = vld [vmem:[%s692_s4] ss:$0 sm:$0xff] }
 0x11d   :  { %v222_v57 = vadd.f32 %v218_v55, %v155_v47  ;;  %545 = vpow2.f32 %v230_v54  ;;  %v263_v2 = vrot.slane %v209_v59, 2 }
 0x11f   :  { %v225_v60 = vadd.f32 %v223_v46, %v222_v57 }
 0x121   :  { %v229_v62 = vmin.f32 %v225_v60, 0.0  ;;  %vm227_vm5 = vcmp.gt.f32.partialorder %v225_v60, 0.0 }
 0x122   :  { %v181_v0 = vpop.f32.mrf.mxu2 }
 0x123   :  { %v232_v1 = vmul.f32 1.442695, %v229_v62  ;;  %v259_v3 = vadd.f32 %v255_v61, %v181_v0  ;;  %v546_v6 = vpop.eup %545 }
 0x124   :  { %v478_v11 = vadd.f32 -1.0, %v546_v6  ;;  %v211_v12 = vpop.f32.mrf.mxu0 }
 0x125   :  { %547 = vpow2.f32 %v232_v1  ;;  %v267_v7 = vadd.f32 %v263_v2, %v259_v3  ;;  %v264_v18 = vrot.slane %v211_v12, 2 }
 0x126   :  { %v236_v21 = vsel %vm226_vm3, %v224_v50, %v478_v11 }
 0x127   :  { %v270_v9 = vadd.f32 %v269_v4, %v267_v7  ;;  %v239_v24 = vsel %vm238_vm4, %v236_v21, -inf }
 0x128   :  { %v240_v29 = vrot.slane %v239_v24, 4 }
 0x129   :  { %v274_v14 = vmin.f32 %v270_v9, 0.0  ;;  %vm272_vm7 = vcmp.gt.f32.partialorder %v270_v9, 0.0 }
 0x12a   :  { %v183_v15 = vpop.f32.mrf.mxu2  ;;  %v241_v34 = vmax.f32 %v239_v24, %v240_v29  ;;  %v544_v29 = vld [vmem:[#allocation2] ss:$0 sm:$0xff] }
 0x12b   :  { %v548_v16 = vpop.eup %547  ;;  %v276_v17 = vmul.f32 1.442695, %v274_v14  ;;  %v260_v19 = vadd.f32 %v256_v13, %v183_v15 }
 0x12c   :  { %v479_v22 = vadd.f32 -1.0, %v548_v16  ;;  %v242_v39 = vrot.slane %v241_v34, 2 }
 0x12d   :  { %549 = vpow2.f32 %v276_v17  ;;  %v268_v23 = vadd.f32 %v264_v18, %v260_v19 }
 0x12e   :  { %v237_v27 = vsel %vm227_vm5, %v225_v60, %v479_v22  ;;  %v243_v47 = vmax.f32 %v241_v34, %v242_v39 }
 0x12f   :  { %v271_v25 = vadd.f32 %v269_v4, %v268_v23  ;;  %v246_v31 = vsel %vm238_vm4, %v237_v27, -inf }
 0x130   :  { %v247_v35 = vrot.slane %v246_v31, 4  ;;  %v244_v53 = vrot.slane %v243_v47, 1 }
 0x131   :  { %v275_v28 = vmin.f32 %v271_v25, 0.0  ;;  %vm273_vm8 = vcmp.gt.f32.partialorder %v271_v25, 0.0 }
 0x132   :  { %v248_v40 = vmax.f32 %v246_v31, %v247_v35  ;;  %v245_v57 = vmax.f32 %v243_v47, %v244_v53 }
 0x133   :  { %v550_v30 = vpop.eup %549  ;;  %v278_v32 = vmul.f32 1.442695, %v275_v28 }
 0x134   :  { %v480_v33 = vadd.f32 -1.0, %v550_v30  ;;  %v249_v45 = vrot.slane %v248_v40, 2 }
 0x135   :  { %551 = vpow2.f32 %v278_v32 }
 0x136   :  { %v282_v36 = vsel %vm272_vm7, %v270_v9, %v480_v33  ;;  %v250_v54 = vmax.f32 %v248_v40, %v249_v45 }
 0x137   :  { %v285_v37 = vsel %vm284_vm6, %v282_v36, -inf }
 0x138   :  { %v286_v38 = vrot.slane %v285_v37, 4  ;;  %v251_v58 = vrot.slane %v250_v54, 1 }
 0x13a   :  { %v287_v41 = vmax.f32 %v285_v37, %v286_v38  ;;  %v252_v62 = vmax.f32 %v250_v54, %v251_v58 }
 0x13b   :  { %v552_v42 = vpop.eup %551 }
 0x13c   :  { %v288_v43 = vrot.slane %v287_v41, 2  ;;  %v481_v44 = vadd.f32 -1.0, %v552_v42 }
 0x13e   :  { %v283_v46 = vsel %vm273_vm8, %v271_v25, %v481_v44  ;;  %v289_v48 = vmax.f32 %v287_v41, %v288_v43  ;;  %v543_v25 = vld [vmem:[%s693_s5] ss:$0 sm:$0xff] }
 0x13f   :  { %v292_v49 = vsel %vm284_vm6, %v283_v46, -inf }
 0x140   :  { %v293_v50 = vrot.slane %v292_v49, 4  ;;  %v290_v51 = vrot.slane %v289_v48, 1 }
 0x142   :  { %v294_v52 = vmax.f32 %v292_v49, %v293_v50  ;;  %v291_v56 = vmax.f32 %v289_v48, %v290_v51 }
 0x144   :  { %v295_v55 = vrot.slane %v294_v52, 2  ;;  %v299_v61 = vadd.f32 %v291_v56, %v245_v57 }
 0x146   :  { %v296_v59 = vmax.f32 %v294_v52, %v295_v55  ;;  %v301_v1 = vpack.c.bf16 %v299_v61, %v299_v61 }
 0x148   :  { %v297_v60 = vrot.slane %v296_v59, 1  ;;  %v325_v4 = vunpack.c.l.b16 %v301_v1 }
 0x14a   :  { %v298_v63 = vmax.f32 %v296_v59, %v297_v60 }
 0x14c   :  { %v300_v0 = vadd.f32 %v298_v63, %v252_v62 }
 0x14e   :  { %v302_v2 = vpack.c.bf16 %v300_v0, %v300_v0  ;;  %v407_v3 = vsel %vm327_vm9, %v300_v0, %v299_v61 }
 0x150   :  { %v326_v5 = vunpack.c.l.b16 %v302_v2 }
 0x152   :  { %v328_v6 = vsel %vm327_vm9, %v326_v5, %v325_v4 }
 0x153   :  { %v329_v7 = vpack.c.b16 %v328_v6, %v328_v6 }
 0x155   :  { %387 = vmatmul.bf16.vlgmr.msra.gmra.mxu1 %v329_v7 }
 0x1d2   :  { %v388_v9 = vpop.f32.mrf.mxu1 }
 0x1d3   :  { %v389_v10 = vadd.f32 %v542_v8, %v388_v9 }
 0x1d5   :  { %v392_v11 = vsub.f32 0.0, %v389_v10  ;;  %v398_v12 = vmin.f32 %v389_v10, 0.0  ;;  %vm397_vm10 = vcmp.gt.f32.partialorder %v389_v10, 0.0 }
 0x1d7   :  { %v393_v13 = vmul.f32 1.442695, %v392_v11  ;;  %v399_v14 = vmul.f32 1.442695, %v398_v12 }
 0x1d9   :  { %553 = vpow2.f32 %v393_v13 }
 0x1da   :  { %v390_v15 = vpop.f32.mrf.mxu1  ;;  %555 = vpow2.f32 %v399_v14 }
 0x1df   :  { %v554_v16 = vpop.eup %553 }
 0x1e0   :  { %v395_v17 = vadd.f32 1.0, %v554_v16  ;;  %v556_v18 = vpop.eup %555 }
 0x1e1   :  { %v514_v19 = vadd.f32 -1.0, %v556_v18 }
 0x1e2   :  { %557 = vrcp.f32 %v395_v17 }
 0x1e3   :  { %v402_v22 = vsel %vm397_vm10, %v389_v10, %v514_v19 }
 0x1e8   :  { %v558_v20 = vpop.eup %557 }
 0x1e9   :  { %v404_v21 = vsub.f32 1.0, %v558_v20  ;;  %v403_v23 = vmul.f32 %v558_v20, %v402_v22 }
 0x1eb   :  { %v409_v24 = vmul.f32 %v407_v3, %v404_v21 }
 0x1ed   :  { %v410_v26 = vadd.f32 %v409_v24, %v403_v23 }
 0x1ef   :  { %v415_v27 = vmul.f32 %v543_v25, %v410_v26 }
 0x1f1   :  { %v417_v28 = vsel %vm416_vm11, %v415_v27, 0.0 }
 0x1f2   :  { %418 = vadd.xlane.f32.xlu1 %v417_v28 }
 0x265   :  { %v419_v30 = vpop.xlane.xlu1 %418 }
 0x266   :  { %v424_v31 = vadd.f32 %v544_v29, %v419_v30 }
 0x268   :  { %426 = vst.msk [vmem:[%s695_s7] sm:$0x3] %vm425_vm12, %v424_v31 }
 0x269   :  { %431 = vsyncpa [#allocation4], 1 }
 0x26a   :  { %432 = vsyncpa [#allocation6], 1 }

</bundles_post_ra>
